<compile_context>
chip_gen: v7x
topology: tpu7x:2x2x1
jax: 0.10.0
libtpu: 0.0.40
codegen_flags: <defaults>
</compile_context>

<pallas_src>
import math

import jax
import jax.numpy as jnp
from jax.experimental import pallas as pl
from jax.experimental.pallas import tpu as pltpu

_LOG_CLAMP = math.log(1e-7)  # torch.clamp(softmax, min=1e-7) applied in log space


def _ce_kernel(x_ref, t_ref, out_ref):
    """One (batch, hw-tile) step: per-class partial sum of targets * log(clamped softmax)."""
    x = x_ref[...].astype(jnp.float32)      # (1, C, T)
    t = t_ref[...].astype(jnp.float32)      # (1, C, T)

    # log(max(softmax(x), 1e-7)) == max((x - m) - log(sum exp(x - m)), log 1e-7)
    m = jnp.max(x, axis=1, keepdims=True)   # (1, 1, T)  channel max (XLU)
    xm = x - m                              # hoisted once (single broadcast + sub)
    e = jnp.exp(xm)                         # one exp per element (EUP)
    s = jnp.sum(e, axis=1, keepdims=True)   # (1, 1, T)
    logp = jnp.maximum(xm - jnp.log(s), _LOG_CLAMP)

    # Per-class lane reduction (XLU); all remaining reductions deferred to JAX epilogue.
    pc = jnp.sum(t * logp, axis=2, keepdims=True)            # (1, C, 1)
    # Lane-dense store of the tiny per-(b, h) partial block (unmasked vst).
    out_ref[...] = jnp.broadcast_to(pc.reshape(1, 1, -1, 1), out_ref.shape)


def _plan_tiling(hw, c, x_bytes, t_bytes):
    """Pick the HW (lane) tile width and a matching scoped-VMEM limit."""
    try:
        vmem_cap = int(pltpu.get_tpu_info().vmem_capacity_bytes)
    except Exception:
        vmem_cap = 64 * 1024 * 1024  # conservative fallback (v7x per-TC size)

    # Per-lane working set: 2 pipeline buffers per tensor input (wire dtype) plus
    # ~6 f32-sized (C, tile) intermediates the compiler may materialize in VMEM.
    per_lane = c * (2 * (x_bytes + t_bytes) + 6 * 4)
    budget = (vmem_cap * 3 // 4) // 2

    tile = 128
    for cand in (128, 256, 512, 1024, 2048, 4096, 8192, 16384, 32768, 65536):
        if cand * per_lane <= budget:
            tile = cand
        else:
            break

    hw128 = ((hw + 127) // 128) * 128
    tile = min(tile, hw128)  # never wider than the (128-rounded) data

    # Avoid excessive zero-padding (> ~12.5% of the real data) from oversized tiles.
    def _padded(t_):
        return ((hw128 + t_ - 1) // t_) * t_

    while tile > 512 and (_padded(tile) - hw128) * 8 > hw128:
        tile //= 2

    needed = per_lane * tile + 4 * c * 128 * 4  # blocks + (double-buffered) output
    vmem_limit = int(min(vmem_cap * 9 // 10, max(needed * 3, 32 * 1024 * 1024)))
    return tile, vmem_limit


def cross_entropy_pallas(inputs, targets, weight=None):
    """inputs, targets: (N, C, H, W). Returns scalar f32 loss matching the torch module."""
    N, C, H, W = inputs.shape
    HW = H * W
    total_count = float(N * C * H * W)

    if weight is None:
        weight = [1.0]
    w = jnp.broadcast_to(jnp.asarray(weight, dtype=jnp.float32), (C,))

    def _wire(a):
        dt = jnp.dtype(a.dtype)
        if dt not in (jnp.dtype(jnp.float32), jnp.dtype(jnp.bfloat16)):
            a = a.astype(jnp.float32)
        return a.reshape(N, C, HW)

    x = _wire(inputs)
    t = _wire(targets)

    tile_hw, vmem_limit = _plan_tiling(HW, C, x.dtype.itemsize, t.dtype.itemsize)

    # Pad the lane axis up to a multiple of the chosen tile; padded targets are zero,
    # so padded columns contribute exactly 0 to the loss.
    hw_p = ((HW + tile_hw - 1) // tile_hw) * tile_hw
    if hw_p != HW:
        pad = hw_p - HW
        x = jnp.pad(x, ((0, 0), (0, 0), (0, pad)))
        t = jnp.pad(t, ((0, 0), (0, 0), (0, pad)))
    num_h = hw_p // tile_hw

    partials = pl.pallas_call(
        _ce_kernel,
        out_shape=jax.ShapeDtypeStruct((N, num_h, C, 128), jnp.float32),
        grid_spec=pltpu.PrefetchScalarGridSpec(
            num_scalar_prefetch=0,
            grid=(N, num_h),
            in_specs=[
                pl.BlockSpec((1, C, tile_hw), lambda b, h: (b, 0, h)),  # inputs tile
                pl.BlockSpec((1, C, tile_hw), lambda b, h: (b, 0, h)),  # targets tile
            ],
            out_specs=pl.BlockSpec((1, 1, C, 128), lambda b, h: (b, h, 0, 0)),
        ),
        compiler_params=pltpu.CompilerParams(
            # No cross-step carry: every (b, h) block is independent -> both axes
            # parallel so v7x can split across its two TensorCores for any N.
            dimension_semantics=("parallel", "parallel"),
            vmem_limit_bytes=vmem_limit,
        ),
    )(x, t)

    # Tiny epilogue in plain JAX: sum partials, apply class weights, negate, mean.
    per_class = jnp.sum(partials[:, :, :, 0], axis=(0, 1))  # (C,)
    return -jnp.sum(w * per_class) / total_count


def cross_entropy_ref(inputs, targets, weight=None):
    """Plain-JAX reference mirroring the PyTorch forward."""
    if weight is None:
        weight = [1.0]
    out = jax.nn.softmax(inputs, axis=1)
    out = jnp.maximum(out, 1e-7)
    logit = targets * jnp.log(out)
    w = jnp.asarray(weight, dtype=inputs.dtype)[None, :, None, None]
    logit = w * logit
    return -jnp.mean(logit)


if __name__ == "__main__":
    key = jax.random.PRNGKey(0)
    k1, k2 = jax.random.split(key)

    N, C, H, W = 2, 4, 16, 16
    inputs = jax.random.normal(k1, (N, C, H, W), dtype=jnp.float32)
    # one-hot-like soft targets over the channel axis
    logits_t = jax.random.normal(k2, (N, C, H, W), dtype=jnp.float32)
    targets = jax.nn.softmax(logits_t, axis=1)

    loss = cross_entropy_pallas(inputs, targets)
    loss = jax.block_until_ready(loss)

    ref = cross_entropy_ref(inputs, targets)
    assert jnp.allclose(loss, ref, atol=1e-5, rtol=1e-5), (loss, ref)

    print("KERNEL_OK")
</pallas_src>

<mosaic_0001>
module attributes {stable_mosaic.version = 11 : i64} {
  func.func @_ce_kernel(%arg0: i32, %arg1: i32, %arg2: memref<1x4x256xf32, #tpu.memory_space<vmem>>, %arg3: memref<1x4x256xf32, #tpu.memory_space<vmem>>, %arg4: memref<1x1x4x128xf32, #tpu.memory_space<vmem>>) attributes {dimension_semantics = [#tpu.dimension_semantics<parallel>, #tpu.dimension_semantics<parallel>], iteration_bounds = array<i64: 2, 1>, scalar_prefetch = 0 : i64, scratch_operands = 0 : i64, tpu.core_type = #tpu.core_type<tc>, window_params = [{transform_indices = @transform_0, window_bounds = array<i64: 1, 4, 256>}, {transform_indices = @transform_1, window_bounds = array<i64: 1, 4, 256>}, {transform_indices = @transform_2, window_bounds = array<i64: 1, 1, 4, 128>}]} {
    %c0 = arith.constant 0 : index
    %c0_0 = arith.constant 0 : index
    %c0_1 = arith.constant 0 : index
    %0 = vector.load %arg2[%c0, %c0_0, %c0_1] : memref<1x4x256xf32, #tpu.memory_space<vmem>>, vector<1x4x256xf32>
    %c0_2 = arith.constant 0 : index
    %c0_3 = arith.constant 0 : index
    %c0_4 = arith.constant 0 : index
    %1 = vector.load %arg3[%c0_2, %c0_3, %c0_4] : memref<1x4x256xf32, #tpu.memory_space<vmem>>, vector<1x4x256xf32>
    %cst = arith.constant dense<0xFF800000> : vector<1x256xf32>
    %2 = vector.multi_reduction <maximumf>, %0, %cst [1] : vector<1x4x256xf32> to vector<1x256xf32>
    %3 = vector.shape_cast %2 : vector<1x256xf32> to vector<1x1x256xf32>
    %4 = vector.broadcast %3 : vector<1x1x256xf32> to vector<1x4x256xf32>
    %5 = arith.subf %0, %4 : vector<1x4x256xf32>
    %6 = math.exp %5 : vector<1x4x256xf32>
    %cst_5 = arith.constant dense<0.000000e+00> : vector<1x256xf32>
    %7 = vector.multi_reduction <add>, %6, %cst_5 [1] : vector<1x4x256xf32> to vector<1x256xf32>
    %8 = vector.shape_cast %7 : vector<1x256xf32> to vector<1x1x256xf32>
    %9 = math.log %8 : vector<1x1x256xf32>
    %10 = vector.broadcast %9 : vector<1x1x256xf32> to vector<1x4x256xf32>
    %11 = arith.subf %5, %10 : vector<1x4x256xf32>
    %cst_6 = arith.constant -16.1180954 : f32
    %12 = vector.broadcast %cst_6 : f32 to vector<1x4x256xf32>
    %13 = arith.maximumf %11, %12 : vector<1x4x256xf32>
    %14 = arith.mulf %1, %13 : vector<1x4x256xf32>
    %cst_7 = arith.constant dense<0.000000e+00> : vector<1x4xf32>
    %15 = vector.multi_reduction <add>, %14, %cst_7 [2] : vector<1x4x256xf32> to vector<1x4xf32>
    %16 = vector.shape_cast %15 : vector<1x4xf32> to vector<1x4x1xf32>
    %17 = vector.shape_cast %16 : vector<1x4x1xf32> to vector<1x1x4x1xf32>
    %18 = vector.shape_cast %17 : vector<1x1x4x1xf32> to vector<1x1x4x1xf32>
    %19 = vector.broadcast %18 : vector<1x1x4x1xf32> to vector<1x1x4x128xf32>
    %c0_8 = arith.constant 0 : index
    %c0_9 = arith.constant 0 : index
    %c0_10 = arith.constant 0 : index
    %c0_11 = arith.constant 0 : index
    %20 = vector.load %arg4[%c0_8, %c0_9, %c0_10, %c0_11] : memref<1x1x4x128xf32, #tpu.memory_space<vmem>>, vector<1x1x4x128xf32>
    tpu.vector_store %arg4[%c0_8, %c0_9, %c0_10, %c0_11], %19 {strides = array<i32>} : memref<1x1x4x128xf32, #tpu.memory_space<vmem>>, vector<1x1x4x128xf32>,
    return
  }
  func.func @transform_0(%arg0: i32, %arg1: i32) -> (i32, i32, i32) {
    %c0_i32 = arith.constant 0 : i32
    %c0_i32_0 = arith.constant 0 : i32
    return %arg0, %c0_i32, %arg1 : i32, i32, i32
  }
  func.func @transform_1(%arg0: i32, %arg1: i32) -> (i32, i32, i32) {
    %c0_i32 = arith.constant 0 : i32
    %c0_i32_0 = arith.constant 0 : i32
    return %arg0, %c0_i32, %arg1 : i32, i32, i32
  }
  func.func @transform_2(%arg0: i32, %arg1: i32) -> (i32, i32, i32, i32) {
    %c0_i32 = arith.constant 0 : i32
    %c0_i32_0 = arith.constant 0 : i32
    %c0_i32_1 = arith.constant 0 : i32
    return %arg0, %arg1, %c0_i32, %c0_i32_0 : i32, i32, i32, i32
  }
}

</mosaic_0001>

<bundles_post_ra>
// kernel: tpu_custom_call.1
= control target key start
LH: loop header
LB: loop body
LE: loop exit
PB: predicated region body
PF: predicated region fallthrough
CT: control target
= control target key end

     0   :  { %7 = vsyncpa [#allocation3], 0  ;;  %s899_s0 = inlined_call_operand.hbm [shape: f32[2,4,256], index: 0, kind: input, shape index: {}]   ;;  %s900_s1 = inlined_call_operand.hbm [shape: f32[2,4,256], index: 1, kind: input, shape index: {}]   ;;  %s901_s2 = inlined_call_operand.hbm [shape: f32[2,1,4,128], index: 2, kind: output, shape index: {}]  }
   0x1   :  { %9 = vsyncpa [#allocation3 + $0x1], 0 }
   0x2   :  { %10 = vsyncpa [#allocation6], 0 }
   0x3   :  { %12 = vsyncpa [#allocation6 + $0x1], 0 }
   0x4   :  { %13 = vsyncpa [#allocation4], 0 }
   0x5   :  { %15 = vsyncpa [#allocation4 + $0x1], 0  ;;  %s669_s9 = smov 0   ;;  %s671_s10 = smov 0  }
   0x6   :  { %s673_s11 = smov 0   ;;  %s675_s12 = smov 0  }
   0x7   :  { %s677_s13 = smov 0   ;;  %s679_s14 = smov 0  }
   0x8 LB: > { %s409_s15 = sadd.s32 4294967295, %s649_s14   ;;  %s410_s16 = sadd.s32 4294967294, %s649_s14   ;;  %s649_s14 = sphi %s679_s14, %s21_s14   ;;  %s645_s13 = sphi %s677_s13, %s921_s13   ;;  %s641_s12 = sphi %s675_s12, %s920_s12   ;;  %s637_s11 = sphi %s673_s11, %s919_s11   ;;  %s633_s10 = sphi %s671_s10, %s918_s10   ;;  %s629_s9 = sphi %s669_s9, %s917_s9  }
   0x9   : > { %s33_s17 = sadd.s32 1, %s645_s13  ;;  %s42_s18 = sadd.s32 1, %s637_s11 }
   0xa   : > { %p35_p0 = scmp.ge.s32.totalorder %s33_s17, 2  ;;  %p49_p1 = scmp.ne.s32.totalorder %s637_s11, %s633_s10 }
   0xb   : > { %p50_p2 = scmp.eq.s32.totalorder %s649_s14, 0  ;;  %p55_p3 = scmp.ne.s32.totalorder %s633_s10, %s629_s9 }
   0xc   : > { %s923_s17 = smov (%p35_p0, %s33_s17), 0  ;;  %p56_p5 = scmp.eq.s32.totalorder %s409_s15, 0 }
   0xd   : > { %p710_p4 = por %p50_p2, %p49_p1  ;;  %s37_s20 = ssub.s32 %s645_s13, %s923_s17 }
   0xe   : > { %p109_p6 = scmp.eq.s32.totalorder %s409_s15, 1  ;;  %p40_p7 = scmp.eq.s32.totalorder %s37_s20, 0 }
   0xf   : > { %p716_p8 = por %p56_p5, %p55_p3  ;;  %p115_p10 = scmp.eq.s32.totalorder %s410_s16, 1 }
  0x10   : > { %p720_p9 = por %p109_p6, %p49_p1  ;;  %p446_p13 = scmp.lt.s32.totalorder %s649_s14, 2 }
  0x11   : > { %s905_s21 = scalar_select %p716_p8, 1, 0 }
  0x12   : > { %s906_s22 = scalar_select %p720_p9, 1, 0 }
  0x13   : > { %s725_s23 = scalar_select %p40_p7, %s637_s11, %s42_s18  }
  0x14   : > { %p727_p11 = por %p115_p10, %p55_p3  ;;  %s734_s25 = sand.u32 1, %s637_s11  }
  0x15   : > { %s413_s26 = sshll.u32 %s734_s25, 3  ;;  %s427_s27 = sshll.u32 %s645_s13, 7 }
  0x16   : > { %s907_s24 = scalar_select %p727_p11, 1, 0 }
  0x17   : > { %s743_s30 = scalar_lea.hbm %s899_s0, %s427_s27  ;;  %s139_s3 = scalar_lea.vmem [#allocation2], %s413_s26 }
  0x18   : > { %s149_s4 = sshll.u32 %s139_s3, 4  ;;  %p751_p0 = pnand %p446_p13, %p710_p4  ;;  %s747_s4 = int_to_ptr.vmem [resolvable:$true] %s149_s4 }
  0x19   : > { %s136_s6 = scalar_lea.sflag [#allocation3], %s734_s25  ;;  %s503_s7 = scalar_lea.hbm %s743_s30, 128 }
  0x1a   : > { %p504_p3 = scmp.ne.s32.totalorder %s743_s30, %s503_s7  ;;  %p505_p5 = pneg %p751_p0 }
  0x1b   : > { %s508_s16 = scalar_lea.hbm %s899_s0, 256  ;;  %p509_p4 = scmp.lt.u32.totalorder %s743_s30, %s899_s0 }
  0x1c   : > { %p506_p6 = pnand %p505_p5, %p504_p3  ;;  %p510_p10 = scmp.lt.u32.totalorder %s508_s16, %s503_s7 }
  0x1d   : > { %p512_p12 = scmp.lt.u32.totalorder %s503_s7, %s743_s30 }
  0x1e   : > { %p507_p7 = pneg %p506_p6  ;;  %p511_p13 = por %p510_p10, %p509_p4 }
  0x20   : > { %p513_p1 = por %p512_p12, %p511_p13 }
  0x22   : > { %p514_p2 = pnand %p513_p1, %p507_p7 }
  0x24   : > { %517 = shalt.err (!%p514_p2)
}
  0x25   : > { %s518_s20 = scalar_lea.vmem %s747_s4, 128  ;;  %s651_s28 = smov [#allocation2]  }
  0x26   : > { %p519_p3 = scmp.ne.s32.totalorder %s747_s4, %s518_s20  ;;  %s523_s29 = sshll.u32 %s651_s28, 4  ;;  %s524_s29 = int_to_ptr.vmem [resolvable:$false] %s523_s29 }
  0x27   : > { %s525_s3 = scalar_lea.vmem %s524_s29, 256  ;;  %p526_p9 = scmp.lt.s32.totalorder %s747_s4, %s524_s29 }
  0x28   : > { %p521_p6 = pnand %p519_p3, %p505_p5  ;;  %p527_p4 = scmp.lt.s32.totalorder %s525_s3, %s518_s20 }
  0x2a   : > { %p522_p11 = pneg %p521_p6  ;;  %p528_p10 = por %p527_p4, %p526_p9 }
  0x2c   : > { %p529_p12 = pnand %p528_p10, %p522_p11 }
  0x2e   : > { %532 = shalt.err (!%p529_p12)
}
  0x2f   : > { %438 = dma.hbm_to_vmem [thread:$0]  (!%p751_p0), %s743_s30, 128, %s747_s4, %s136_s6  }
  0x30   : > { %p909_p1 = scmp.lt.s32.totalorder %s649_s14, 3  ;;  %p910_p2 = scmp.ge.s32.totalorder %s649_s14, 1 }
  0x31   : > { %s796_s16 = scalar_lea.hbm %s900_s1, %s427_s27  ;;  %s160_s18 = scalar_lea.vmem [#allocation5], %s413_s26 }
  0x32   : > { %p787_p7 = pnand %p910_p2, %p909_p1  ;;  %s170_s19 = sshll.u32 %s160_s18, 4  ;;  %s171_s19 = int_to_ptr.vmem [resolvable:$true] %s170_s19 }
  0x33   : > { %s157_s30 = scalar_lea.sflag [#allocation6], %s734_s25  ;;  %s533_s4 = scalar_lea.hbm %s796_s16, 128 }
  0x34   : > { %s911_s7 = scalar_select %p787_p7, 1, 0 }
  0x35   : > { %p534_p9 = scmp.ne.s32.totalorder %s796_s16, %s533_s4  ;;  %s538_s27 = scalar_lea.hbm %s900_s1, 256 }
  0x36   : > { %p539_p3 = scmp.lt.u32.totalorder %s796_s16, %s900_s1  ;;  %p540_p6 = scmp.lt.u32.totalorder %s538_s27, %s533_s4 }
  0x37   : > { %p536_p11 = pnand %p534_p9, %p505_p5  ;;  %p542_p10 = scmp.lt.u32.totalorder %s533_s4, %s796_s16 }
  0x38   : > { %p541_p4 = por %p540_p6, %p539_p3 }
  0x39   : > { %p537_p13 = pneg %p536_p11 }
  0x3a   : > { %p543_p12 = por %p542_p10, %p541_p4 }
  0x3c   : > { %p544_p1 = pnand %p543_p12, %p537_p13 }
  0x3e   : > { %547 = shalt.err (!%p544_p1)
}
  0x3f   : > { %s548_s25 = scalar_lea.vmem %s171_s19, 128  ;;  %s652_s26 = smov [#allocation5]  }
  0x40   : > { %p549_p2 = scmp.ne.s32.totalorder %s171_s19, %s548_s25  ;;  %s553_s3 = sshll.u32 %s652_s26, 4  ;;  %s554_s3 = int_to_ptr.vmem [resolvable:$false] %s553_s3 }
  0x41   : > { %s555_s8 = scalar_lea.vmem %s554_s3, 256  ;;  %p556_p8 = scmp.lt.s32.totalorder %s171_s19, %s554_s3 }
  0x42   : > { %p551_p9 = pnand %p549_p2, %p505_p5  ;;  %p557_p7 = scmp.lt.s32.totalorder %s555_s8, %s548_s25 }
  0x44   : > { %p552_p11 = pneg %p551_p9  ;;  %p558_p3 = por %p557_p7, %p556_p8 }
  0x46   : > { %p559_p6 = pnand %p558_p3, %p552_p11 }
  0x48   : > { %562 = shalt.err (!%p559_p6)
}
  0x49   : > { %441 = dma.hbm_to_vmem [thread:$0]  (!%p751_p0), %s796_s16, 128, %s171_s19, %s157_s30  }
  0x4a   : > { %p912_p13 = scmp.ne.s32.totalorder %s911_s7, 0 }
  0x4b   : > { %s823_s15 = sand.u32 (!%p912_p13), 1, %s633_s10   ;;  %p913_p5 = scmp.ne.s32.totalorder (!%p912_p13), %s905_s21, 0 }
  0x4c   : > { %179 = sbr.rel (%p912_p13) target bundleno = 316 (0x13c), region = 28  ;;  %s420_s18 = sshll.u32 (!%p912_p13), %s823_s15, 3 }
  0x4d   : > { %s182_s4 = scalar_lea.sflag (!%p912_p13), [#allocation3], %s823_s15  ;;  %s185_s6 = scalar_lea.vmem (!%p912_p13), [#allocation2], %s420_s18 }
  0x53   : > { %616 = dma.done.wait (%p913_p5), %s182_s4, 128  }
  0x54   : > { %618 = vsyncadd (%p913_p5), %s182_s4, 4294967168  ;;  %s191_s5 = scalar_lea.sflag [#allocation6], %s823_s15  ;;  %s832_s16 = scalar_lea.vmem [#allocation5], %s420_s18 }
  0x55   : > { %620 = dma.done.wait (%p913_p5), %s191_s5, 128  }
  0x56   : > { %622 = vsyncadd (%p913_p5), %s191_s5, 4294967168  ;;  %vm227_vm0 = vcmask 1043456   ;;  %v222_v0 = vld [vmem:[%s185_s6] sm:$0xff]  ;;  %v223_v41 = vld [vmem:[%s832_s16] sm:$0xff]  ;;  %s422_s21 = sshll.u32 %s823_s15, 2  ;;  %s424_s30 = sshll.u32 %s641_s12, 6 }
  0x57   : > { %v225_v1 = vcombine.high %v222_v0, %v222_v0  ;;  %v228_v2 = vsel %vm227_vm0, %v222_v0, -inf  ;;  %s219_s7 = scalar_lea.vmem [#allocation7], %s422_s21  ;;  %s852_s28 = scalar_lea.hbm %s901_s2, %s424_s30 }
  0x58   : > { %v229_v3 = vrot.slane %v228_v2, 4  ;;  %s301_s19 = sshll.u32 %s219_s7, 4  ;;  %s287_s29 = scalar_lea.sflag [#allocation4], %s823_s15  ;;  %s847_s19 = int_to_ptr.vmem [resolvable:$true] %s301_s19 }
  0x59   : > { %v235_v4 = vsel %vm227_vm0, %v225_v1, -inf  ;;  %s563_s25 = scalar_lea.vmem %s847_s19, 64  ;;  %p914_p0 = scmp.ne.s32.totalorder %s906_s22, 0 }
  0x5a   : > { %v230_v5 = vmax.f32 %v228_v2, %v229_v3  ;;  %v236_v6 = vrot.slane %v235_v4, 4  ;;  %p564_p8 = scmp.ne.s32.totalorder %s847_s19, %s563_s25  ;;  %s653_s26 = smov [#allocation7]  }
  0x5b   : > { %s567_s12 = sshll.u32 %s653_s26, 4  ;;  %s568_s12 = int_to_ptr.vmem [resolvable:$false] %s567_s12 }
  0x5c   : > { %v231_v7 = vrot.slane %v230_v5, 2  ;;  %v237_v8 = vmax.f32 %v235_v4, %v236_v6  ;;  %p565_p7 = pnand %p564_p8, %p914_p0  ;;  %s569_s3 = scalar_lea.vmem %s568_s12, 128 }
  0x5d   : > { %p570_p10 = scmp.lt.s32.totalorder %s847_s19, %s568_s12  ;;  %p571_p12 = scmp.lt.s32.totalorder %s569_s3, %s563_s25 }
  0x5e   : > { %v232_v9 = vmax.f32 %v230_v5, %v231_v7  ;;  %v238_v10 = vrot.slane %v237_v8, 2  ;;  %p566_p4 = pneg %p565_p7 }
  0x5f   : > { %p572_p1 = por %p571_p12, %p570_p10 }
  0x60   : > { %v233_v11 = vrot.slane %v232_v9, 1  ;;  %v239_v12 = vmax.f32 %v237_v8, %v238_v10 }
  0x61   : > { %p573_p2 = pnand %p572_p1, %p566_p4 }
  0x62   : > { %v234_v13 = vmax.f32 %v232_v9, %v233_v11  ;;  %v240_v14 = vrot.slane %v239_v12, 1 }
  0x64   : > { %v241_v15 = vmax.f32 %v239_v12, %v240_v14 }
  0x66   : > { %v244_v16 = vcombine.low %v234_v13, %v241_v15 }
  0x68   : > { %v246_v17 = vsub.f32 %v222_v0, %v244_v16 }
  0x6a   : > { %v247_v18 = vmul.f32 1.442695, %v246_v17 }
  0x6c   : > { %497 = vpow2.f32 %v247_v18 }
  0x76   : > { %v498_v19 = vpop.eup %497 }
  0x77   : > { %v250_v20 = vcombine.high %v498_v19, %v498_v19  ;;  %v252_v21 = vsel %vm227_vm0, %v498_v19, 0.0 }
  0x78   : > { %v253_v22 = vrot.slane %v252_v21, 4 }
  0x79   : > { %v259_v23 = vsel %vm227_vm0, %v250_v20, 0.0 }
  0x7a   : > { %v254_v24 = vadd.f32 %v253_v22, %v252_v21  ;;  %v260_v25 = vrot.slane %v259_v23, 4 }
  0x7c   : > { %v255_v26 = vrot.slane %v254_v24, 2  ;;  %v261_v27 = vadd.f32 %v260_v25, %v259_v23 }
  0x7e   : > { %v256_v28 = vadd.f32 %v255_v26, %v254_v24  ;;  %v262_v29 = vrot.slane %v261_v27, 2 }
  0x80   : > { %v257_v30 = vrot.slane %v256_v28, 1  ;;  %v263_v31 = vadd.f32 %v262_v29, %v261_v27 }
  0x82   : > { %v258_v32 = vadd.f32 %v257_v30, %v256_v28  ;;  %v264_v33 = vrot.slane %v263_v31, 1 }
  0x84   : > { %v265_v34 = vadd.f32 %v264_v33, %v263_v31  ;;  %499 = vlog2.f32 %v258_v32 }
  0x86   : > { %501 = vlog2.f32 %v265_v34 }
  0x8e   : > { %v500_v35 = vpop.eup %499 }
  0x8f   : > { %v267_v36 = vmul.f32 0.6931472, %v500_v35 }
  0x90   : > { %v502_v37 = vpop.eup %501 }
  0x91   : > { %v269_v38 = vmul.f32 0.6931472, %v502_v37 }
  0x93   : > { %v272_v39 = vcombine.low %v267_v36, %v269_v38 }
  0x95   : > { %v274_v40 = vsub.f32 %v246_v17, %v272_v39 }
  0x97   : > { %v275_v42 = vmax.f32 %v274_v40, -16.118095 }
  0x99   : > { %v276_v43 = vmul.f32 %v275_v42, %v223_v41 }
  0x9b   : > { %v278_v44 = vcombine.high %v276_v43, %v276_v43  ;;  %v280_v45 = vsel %vm227_vm0, %v276_v43, 0.0 }
  0x9d   : > { %v281_v46 = vsel %vm227_vm0, %v278_v44, 0.0 }
  0x9e   : > { %v282_v47 = vadd.f32 %v281_v46, %v280_v45 }
  0xa0   : > { %283 = vadd.xlane.f32.xlu0 %v282_v47 }
 0x12d   : > { %v284_v48 = vpop.xlane.xlu0 %283 }
 0x12e   : > { %285 = vst [vmem:[%s219_s7] sm:$0xf] %v284_v48 }
 0x12f   : > { %576 = shalt.err (!%p573_p2)
}
 0x130   : > { %s577_s8 = scalar_lea.hbm %s852_s28, 64  ;;  %s581_s4 = scalar_lea.hbm %s901_s2, 128 }
 0x131   : > { %p578_p9 = scmp.ne.s32.totalorder %s852_s28, %s577_s8  ;;  %p582_p6 = scmp.lt.u32.totalorder %s852_s28, %s901_s2 }
 0x132   : > { %p583_p13 = scmp.lt.u32.totalorder %s581_s4, %s577_s8  ;;  %p585_p8 = scmp.lt.u32.totalorder %s577_s8, %s852_s28 }
 0x133   : > { %p579_p11 = pnand %p578_p9, %p914_p0 }
 0x134   : > { %p584_p5 = por %p583_p13, %p582_p6 }
 0x135   : > { %p580_p3 = pneg %p579_p11 }
 0x136   : > { %p586_p7 = por %p585_p8, %p584_p5 }
 0x138   : > { %p587_p4 = pnand %p586_p7, %p580_p3 }
 0x13a   : > { %590 = shalt.err (!%p587_p4)
}
 0x13b   : > { %433 = dma.vmem_to_hbm [thread:$0]  (%p914_p0), %s847_s19, 64, %s852_s28, %s287_s29  }
 0x13c PF: > { %s313_s16 = sand.u32 1, %s629_s9   ;;  %p915_p10 = scmp.ne.s32.totalorder %s907_s24, 0 }
 0x13d   : > { %p916_p12 = scmp.ge.s32.totalorder %s649_s14, 2  ;;  %s314_s21 = scalar_lea.sflag [#allocation4], %s313_s16 }
 0x13f   : > { %p443_p1 = pnand %p916_p12, %p915_p10 }
 0x141   : > { %624 = dma.done.wait (!%p443_p1), %s314_s21, 64  }
 0x142   : > { %626 = vsyncadd (!%p443_p1), %s314_s21, 4294967232  ;;  %s21_s14 = sadd.s32 1, %s649_s14   ;;  %s917_s9 = smov %s633_s10 }
 0x143   : > { %p18_p2 = scmp.ge.s32.totalorder %s21_s14, 4   ;;  %s918_s10 = smov %s637_s11 }
 0x144   : > { %s919_s11 = smov %s725_s23  ;;  %s920_s12 = smov %s645_s13 }
 0x145   : > { %s921_s13 = smov %s923_s17  ;;  %20 = sbr.rel (!%p18_p2) target bundleno = 8 (0x8), region = 86 }
 0x14c   :  { %319 = vsyncpa [#allocation3], 1 }
 0x14d   :  { %321 = vsyncpa [#allocation3 + $0x1], 1 }
 0x14e   :  { %322 = vsyncpa [#allocation6], 1 }
 0x14f   :  { %324 = vsyncpa [#allocation6 + $0x1], 1 }
 0x150   :  { %325 = vsyncpa [#allocation4], 1 }
 0x151   :  { %327 = vsyncpa [#allocation4 + $0x1], 1 }

</bundles_post_ra>
